<compile_context>
chip_gen: v7x
topology: tpu7x:2x2x1
jax: 0.10.0
libtpu: 0.0.40
codegen_flags: <defaults>
</compile_context>

<pallas_src>
import functools

import jax
import jax.numpy as jnp
import numpy as np
from jax.experimental import pallas as pl
from jax.experimental.pallas import tpu as pltpu

_LANES = 128
_ROWS_CAP = 512  # 512 x 128 x 4B = 256 KiB per (double-buffered) tile


def _position_weight_kernel(pw_ref, starts_ref, w_ref, *, tile_rows, max_len):
    """pw_ref:     (L,) f32 SMEM                -- position_weight table
       starts_ref: (tile_rows, 128) int32 VMEM  -- bag start offset per element
       w_ref:      (tile_rows, 128) f32 VMEM    -- output weights tile
    """
    tile_start = pl.program_id(0) * (tile_rows * _LANES)

    # Flat element index of every slot in this dense (rows, 128) tile.
    row = jax.lax.broadcasted_iota(jnp.int32, (tile_rows, _LANES), 0)
    col = jax.lax.broadcasted_iota(jnp.int32, (tile_rows, _LANES), 1)
    idx = tile_start + row * _LANES + col

    # offsets_range: position of the element inside its bag.
    seq = idx - starts_ref[...]

    # weights[i] = position_weight[seq[i]] via an unrolled L-way select
    # (2 VPU ops per table entry; L is the truncation size, typically small).
    # TODO(synk): for large max_len (>~32) switch to jnp.take on a
    # VMEM-resident table instead of the select chain.
    # TODO(synk): fbgemm's bounds-checked gather errors on seq >= max_length;
    # here out-of-range positions silently produce 0.0.
    acc = jnp.zeros((tile_rows, _LANES), jnp.float32)
    for l in range(max_len):
        acc = jnp.where(seq == l, pw_ref[l], acc)
    w_ref[...] = acc


def position_weighted_forward(values, lengths, offsets, position_weight):
    """JAX wrapper mirroring PositionWeightedModule.forward on a JaggedTensor.

    Returns (values, lengths, offsets, weights) -- same jagged structure with
    the `weights` field populated by the Pallas kernel.
    """
    n = int(values.shape[0])
    max_len = int(position_weight.shape[0])

    if n == 0:  # empty jagged batch: nothing to weight
        return values, lengths, offsets, jnp.zeros((0,), jnp.float32)

    # TODO(synk): offsets cast to int32 -> requires total N < 2**31
    # (torchrec offsets are int64).
    offsets_i32 = offsets.astype(jnp.int32)
    pw_f32 = position_weight.astype(jnp.float32)

    # ---- segment search in XLA: vectorized binary search over sorted offsets.
    # bag(i) = largest b with offsets[b] <= i ; start(i) = offsets[bag(i)].
    # (Handles empty bags / duplicate offsets correctly via side="right".)
    idx = jnp.arange(n, dtype=jnp.int32)
    bag = jnp.searchsorted(offsets_i32, idx, side="right") - 1
    starts = jnp.take(offsets_i32, bag)

    # ---- lane-dense (rows, 128) tiling --------------------------------------
    rows_needed = -(-n // _LANES)
    if rows_needed > 8:
        # Prefer >= 2 tiles so the "parallel" grid axis can shard across both
        # TensorCores on v7x; cap at _ROWS_CAP for big inputs.
        tile_rows = min(_ROWS_CAP, ((-(-rows_needed // 2) + 7) // 8) * 8)
    else:
        tile_rows = 8
    num_tiles = -(-rows_needed // tile_rows)
    total_rows = num_tiles * tile_rows

    pad = total_rows * _LANES - n
    starts_padded = jnp.pad(starts, (0, pad)).reshape(total_rows, _LANES)

    kernel = functools.partial(
        _position_weight_kernel, tile_rows=tile_rows, max_len=max_len
    )

    cost = pl.CostEstimate(
        flops=int(total_rows * _LANES * (2 * max_len + 4)),
        transcendentals=0,
        bytes_accessed=int(4 * (2 * total_rows * _LANES + max_len)),
    )

    weights_padded = pl.pallas_call(
        kernel,
        out_shape=jax.ShapeDtypeStruct((total_rows, _LANES), jnp.float32),
        grid_spec=pltpu.PrefetchScalarGridSpec(
            num_scalar_prefetch=0,
            grid=(num_tiles,),
            in_specs=[
                # tiny 1-D weight table: SMEM for cheap scalar reads
                pl.BlockSpec(memory_space=pltpu.MemorySpace.SMEM),
                # per-element bag starts: lane-dense VMEM tiles
                pl.BlockSpec((tile_rows, _LANES), lambda i: (i, 0)),
            ],
            out_specs=pl.BlockSpec((tile_rows, _LANES), lambda i: (i, 0)),
        ),
        compiler_params=pltpu.CompilerParams(
            dimension_semantics=("parallel",),
        ),
        cost_estimate=cost,
    )(pw_f32, starts_padded)

    # TODO(synk): consumers that can accept the padded (rows, 128) layout
    # should take `weights_padded` directly; the flatten + [:n] below costs
    # one extra O(N) copy in XLA.
    weights = weights_padded.reshape(total_rows * _LANES)[:n]
    return values, lengths, offsets, weights


def _reference_weights(offsets_np, n, position_weight_np):
    """Pure-numpy reference of offsets_range + gather."""
    seq = np.empty((n,), dtype=np.int64)
    for b in range(len(offsets_np) - 1):
        s, e = int(offsets_np[b]), int(offsets_np[b + 1])
        seq[s:e] = np.arange(e - s)
    return position_weight_np[seq].astype(np.float32)


if __name__ == "__main__":
    key = jax.random.PRNGKey(0)
    k_len, k_val = jax.random.split(key)

    max_feature_length = 10   # truncation size -> position_weight has 10 entries
    batch = 8                 # number of bags

    # deterministic jagged structure (offsets built host-side: no device sync)
    lengths = jax.random.randint(
        k_len, (batch,), 1, max_feature_length + 1, dtype=jnp.int32
    )
    lengths_np = np.asarray(lengths)
    offsets_np = np.concatenate([[0], np.cumsum(lengths_np)]).astype(np.int32)
    n_values = int(offsets_np[-1])

    offsets = jnp.asarray(offsets_np)
    values = jax.random.randint(k_val, (n_values,), 0, 1000, dtype=jnp.int32)

    # Parameter init exactly as the module: torch.empty([max_length]).fill_(1.0)
    position_weight = jnp.ones((max_feature_length,), dtype=jnp.float32)

    v, l, o, w = position_weighted_forward(values, lengths, offsets, position_weight)
    jax.block_until_ready(w)
    ref = _reference_weights(offsets_np, n_values, np.asarray(position_weight))
    np.testing.assert_allclose(np.asarray(w), ref, rtol=0, atol=0)

    # non-trivial weight vector (verifies the seq/gather path)
    pw2 = jnp.arange(1, max_feature_length + 1, dtype=jnp.float32) * 0.5
    _, _, _, w2 = position_weighted_forward(values, lengths, offsets, pw2)
    jax.block_until_ready(w2)
    ref2 = _reference_weights(offsets_np, n_values, np.asarray(pw2))
    np.testing.assert_allclose(np.asarray(w2), ref2, rtol=1e-6, atol=1e-6)

    # larger jagged batch (incl. empty bags) to exercise the multi-tile grid,
    # the searchsorted segment lookup, and megacore-friendly >=2-tile sizing.
    k2_len, k2_val = jax.random.split(jax.random.PRNGKey(1))
    batch2 = 8192
    lengths2 = jax.random.randint(
        k2_len, (batch2,), 0, max_feature_length + 1, dtype=jnp.int32
    )
    lengths2_np = np.asarray(lengths2)
    offsets2_np = np.concatenate([[0], np.cumsum(lengths2_np)]).astype(np.int32)
    n2 = int(offsets2_np[-1])
    offsets2 = jnp.asarray(offsets2_np)
    values2 = jax.random.randint(k2_val, (n2,), 0, 1000, dtype=jnp.int32)
    _, _, _, w3 = position_weighted_forward(values2, lengths2, offsets2, pw2)
    jax.block_until_ready(w3)
    ref3 = _reference_weights(offsets2_np, n2, np.asarray(pw2))
    np.testing.assert_allclose(np.asarray(w3), ref3, rtol=1e-6, atol=1e-6)

    print("KERNEL_OK")
</pallas_src>

<mosaic_0001>
module attributes {stable_mosaic.version = 11 : i64} {
  func.func @_position_weight_kernel(%arg0: i32, %arg1: memref<10xf32, #tpu.memory_space<smem>>, %arg2: memref<8x128xi32, #tpu.memory_space<vmem>>, %arg3: memref<8x128xf32, #tpu.memory_space<vmem>>) attributes {dimension_semantics = [#tpu.dimension_semantics<parallel>], iteration_bounds = array<i64: 1>, scalar_prefetch = 0 : i64, scratch_operands = 0 : i64, tpu.core_type = #tpu.core_type<tc>, window_params = [{transform_indices = @transform_0, window_bounds = array<i64: 10>}, {transform_indices = @transform_1, window_bounds = array<i64: 8, 128>}, {transform_indices = @transform_2, window_bounds = array<i64: 8, 128>}]} {
    %c1024_i32 = arith.constant 1024 : i32
    %0 = arith.muli %arg0, %c1024_i32 : i32
    %1 = tpu.iota {dimensions = array<i32: 0>} : vector<8x128xi32>
    %2 = tpu.iota {dimensions = array<i32: 1>} : vector<8x128xi32>
    %c128_i32 = arith.constant 128 : i32
    %3 = vector.broadcast %c128_i32 : i32 to vector<8x128xi32>
    %4 = arith.muli %1, %3 : vector<8x128xi32>
    %5 = vector.broadcast %0 : i32 to vector<8x128xi32>
    %6 = arith.addi %5, %4 : vector<8x128xi32>
    %7 = arith.addi %6, %2 : vector<8x128xi32>
    %c0 = arith.constant 0 : index
    %c0_0 = arith.constant 0 : index
    %8 = vector.load %arg2[%c0, %c0_0] : memref<8x128xi32, #tpu.memory_space<vmem>>, vector<8x128xi32>
    %9 = arith.subi %7, %8 : vector<8x128xi32>
    %cst = arith.constant 0.000000e+00 : f32
    %10 = vector.broadcast %cst : f32 to vector<8x128xf32>
    %c0_i32 = arith.constant 0 : i32
    %11 = vector.broadcast %c0_i32 : i32 to vector<8x128xi32>
    %12 = arith.cmpi eq, %9, %11 : vector<8x128xi32>
    %c0_1 = arith.constant 0 : index
    %13 = memref.load %arg1[%c0_1] : memref<10xf32, #tpu.memory_space<smem>>
    %14 = vector.broadcast %13 : f32 to vector<8x128xf32>
    %15 = arith.select %12, %14, %10 : vector<8x128xi1>, vector<8x128xf32>
    %c1_i32 = arith.constant 1 : i32
    %16 = vector.broadcast %c1_i32 : i32 to vector<8x128xi32>
    %17 = arith.cmpi eq, %9, %16 : vector<8x128xi32>
    %c1 = arith.constant 1 : index
    %18 = memref.load %arg1[%c1] : memref<10xf32, #tpu.memory_space<smem>>
    %19 = vector.broadcast %18 : f32 to vector<8x128xf32>
    %20 = arith.select %17, %19, %15 : vector<8x128xi1>, vector<8x128xf32>
    %c2_i32 = arith.constant 2 : i32
    %21 = vector.broadcast %c2_i32 : i32 to vector<8x128xi32>
    %22 = arith.cmpi eq, %9, %21 : vector<8x128xi32>
    %c2 = arith.constant 2 : index
    %23 = memref.load %arg1[%c2] : memref<10xf32, #tpu.memory_space<smem>>
    %24 = vector.broadcast %23 : f32 to vector<8x128xf32>
    %25 = arith.select %22, %24, %20 : vector<8x128xi1>, vector<8x128xf32>
    %c3_i32 = arith.constant 3 : i32
    %26 = vector.broadcast %c3_i32 : i32 to vector<8x128xi32>
    %27 = arith.cmpi eq, %9, %26 : vector<8x128xi32>
    %c3 = arith.constant 3 : index
    %28 = memref.load %arg1[%c3] : memref<10xf32, #tpu.memory_space<smem>>
    %29 = vector.broadcast %28 : f32 to vector<8x128xf32>
    %30 = arith.select %27, %29, %25 : vector<8x128xi1>, vector<8x128xf32>
    %c4_i32 = arith.constant 4 : i32
    %31 = vector.broadcast %c4_i32 : i32 to vector<8x128xi32>
    %32 = arith.cmpi eq, %9, %31 : vector<8x128xi32>
    %c4 = arith.constant 4 : index
    %33 = memref.load %arg1[%c4] : memref<10xf32, #tpu.memory_space<smem>>
    %34 = vector.broadcast %33 : f32 to vector<8x128xf32>
    %35 = arith.select %32, %34, %30 : vector<8x128xi1>, vector<8x128xf32>
    %c5_i32 = arith.constant 5 : i32
    %36 = vector.broadcast %c5_i32 : i32 to vector<8x128xi32>
    %37 = arith.cmpi eq, %9, %36 : vector<8x128xi32>
    %c5 = arith.constant 5 : index
    %38 = memref.load %arg1[%c5] : memref<10xf32, #tpu.memory_space<smem>>
    %39 = vector.broadcast %38 : f32 to vector<8x128xf32>
    %40 = arith.select %37, %39, %35 : vector<8x128xi1>, vector<8x128xf32>
    %c6_i32 = arith.constant 6 : i32
    %41 = vector.broadcast %c6_i32 : i32 to vector<8x128xi32>
    %42 = arith.cmpi eq, %9, %41 : vector<8x128xi32>
    %c6 = arith.constant 6 : index
    %43 = memref.load %arg1[%c6] : memref<10xf32, #tpu.memory_space<smem>>
    %44 = vector.broadcast %43 : f32 to vector<8x128xf32>
    %45 = arith.select %42, %44, %40 : vector<8x128xi1>, vector<8x128xf32>
    %c7_i32 = arith.constant 7 : i32
    %46 = vector.broadcast %c7_i32 : i32 to vector<8x128xi32>
    %47 = arith.cmpi eq, %9, %46 : vector<8x128xi32>
    %c7 = arith.constant 7 : index
    %48 = memref.load %arg1[%c7] : memref<10xf32, #tpu.memory_space<smem>>
    %49 = vector.broadcast %48 : f32 to vector<8x128xf32>
    %50 = arith.select %47, %49, %45 : vector<8x128xi1>, vector<8x128xf32>
    %c8_i32 = arith.constant 8 : i32
    %51 = vector.broadcast %c8_i32 : i32 to vector<8x128xi32>
    %52 = arith.cmpi eq, %9, %51 : vector<8x128xi32>
    %c8 = arith.constant 8 : index
    %53 = memref.load %arg1[%c8] : memref<10xf32, #tpu.memory_space<smem>>
    %54 = vector.broadcast %53 : f32 to vector<8x128xf32>
    %55 = arith.select %52, %54, %50 : vector<8x128xi1>, vector<8x128xf32>
    %c9_i32 = arith.constant 9 : i32
    %56 = vector.broadcast %c9_i32 : i32 to vector<8x128xi32>
    %57 = arith.cmpi eq, %9, %56 : vector<8x128xi32>
    %c9 = arith.constant 9 : index
    %58 = memref.load %arg1[%c9] : memref<10xf32, #tpu.memory_space<smem>>
    %59 = vector.broadcast %58 : f32 to vector<8x128xf32>
    %60 = arith.select %57, %59, %55 : vector<8x128xi1>, vector<8x128xf32>
    %c0_2 = arith.constant 0 : index
    %c0_3 = arith.constant 0 : index
    %61 = vector.load %arg3[%c0_2, %c0_3] : memref<8x128xf32, #tpu.memory_space<vmem>>, vector<8x128xf32>
    tpu.vector_store %arg3[%c0_2, %c0_3], %60 {strides = array<i32>} : memref<8x128xf32, #tpu.memory_space<vmem>>, vector<8x128xf32>,
    return
  }
  func.func @transform_0(%arg0: i32) -> i32 {
    %c0_i32 = arith.constant 0 : i32
    %c0_i32_0 = arith.constant 0 : i32
    return %c0_i32 : i32
  }
  func.func @transform_1(%arg0: i32) -> (i32, i32) {
    %c0_i32 = arith.constant 0 : i32
    %c0_i32_0 = arith.constant 0 : i32
    return %arg0, %c0_i32 : i32, i32
  }
  func.func @transform_2(%arg0: i32) -> (i32, i32) {
    %c0_i32 = arith.constant 0 : i32
    %c0_i32_0 = arith.constant 0 : i32
    return %arg0, %c0_i32 : i32, i32
  }
}

</mosaic_0001>

<bundles_post_ra>
// kernel: tpu_custom_call.1
= control target key start
LH: loop header
LB: loop body
LE: loop exit
PB: predicated region body
PF: predicated region fallthrough
CT: control target
= control target key end

     0   :  { %7 = vsyncpa [#allocation5], 0  ;;  %s241_s0 = inlined_call_operand.hbm [shape: f32[10], index: 0, kind: input, shape index: {}]   ;;  %s242_s1 = inlined_call_operand.hbm [shape: s32[8,128], index: 1, kind: input, shape index: {}]   ;;  %s243_s2 = inlined_call_operand.hbm [shape: f32[8,128], index: 2, kind: output, shape index: {}]  }
   0x1   :  { %8 = vsyncpa [#allocation3], 0 }
   0x2   :  { %9 = vsyncpa [#allocation4], 0  ;;  %s115_s11 = scalar_lea.hbm %s241_s0, 16 }
   0x3   :  { %p116_p0 = scmp.ne.s32.totalorder %s241_s0, %s115_s11  ;;  %p119_p1 = scmp.lt.u32.totalorder %s115_s11, %s241_s0 }
   0x5   :  { %p121_p2 = pnand %p119_p1, %p116_p0 }
   0x7   :  { %124 = shalt.err (!%p121_p2)
}
   0x8   :  { %s175_s16 = smov [#allocation2]   ;;  %s176_s19 = smov [#allocation6]  }
   0x9   :  { %17 = dma.hbm_to_smem %s241_s0, 16, %s175_s16, [#allocation5]  }
   0xa   :  { %s24_s20 = sshll.u32 %s176_s19, 4  ;;  %s125_s23 = scalar_lea.hbm %s242_s1, 128  ;;  %s25_s20 = int_to_ptr.vmem [resolvable:$true] %s24_s20 }
   0xb   :  { %p126_p3 = scmp.ne.s32.totalorder %s242_s1, %s125_s23  ;;  %p129_p4 = scmp.lt.u32.totalorder %s125_s23, %s242_s1 }
   0xd   :  { %p131_p5 = pnand %p129_p4, %p126_p3 }
   0xf   :  { %134 = shalt.err (!%p131_p5)
}
  0x10   :  { %s135_s28 = scalar_lea.vmem %s25_s20, 128  ;;  %p140_p7 = scmp.lt.s32.totalorder %s25_s20, %s25_s20 }
  0x11   :  { %p136_p6 = scmp.ne.s32.totalorder %s25_s20, %s135_s28  ;;  %p141_p8 = scmp.lt.s32.totalorder %s135_s28, %s135_s28 }
  0x13   :  { %p142_p9 = por %p141_p8, %p140_p7 }
  0x15   :  { %p143_p10 = pnand %p142_p9, %p136_p6 }
  0x17   :  { %146 = shalt.err (!%p143_p10)
}
  0x18   :  { %27 = dma.hbm_to_vmem [thread:$0]  %s242_s1, 128, %s25_s20, [#allocation3]  }
  0x19   :  { %169 = dma.done.wait [#allocation5], 16  }
  0x1a   :  { %170 = vsyncadd [#allocation5], 4294967280 }
  0x1b   :  { %171 = dma.done.wait [#allocation3], 128  }
  0x1c   :  { %172 = vsyncadd [#allocation3], 4294967168 }
  0x1d   :  { %34 = sfence }
  0x1e   :  { %v36_v0 = vlaneseq  ;;  %s47_s30 = sld [smem:[#allocation2]]  ;;  %s103_s3 = sld [smem:[#allocation2 + $0x1]]  ;;  %v44_v4 = vld [vmem:[#allocation6] sm:$0xff] }
  0x1f   :  { %s104_s4 = sld [smem:[#allocation2 + $0x2]]  ;;  %s105_s5 = sld [smem:[#allocation2 + $0x3]] }
  0x20   :  { %v37_v1 = vshrl.u32 %v36_v0, 7  ;;  %v39_v2 = vand.u32 127, %v36_v0  ;;  %s106_s6 = sld [smem:[#allocation2 + $0x4]]  ;;  %s107_s7 = sld [smem:[#allocation2 + $0x5]] }
  0x21   :  { %s217_s8 = sld [smem:[#allocation2 + $0x6]]  ;;  %s219_s1 = sld [smem:[#allocation2 + $0x7]] }
  0x22   :  { %v40_v3 = vmul.u32 128, %v37_v1  ;;  %s221_s9 = sld [smem:[#allocation2 + $0x8]]  ;;  %s223_s10 = sld [smem:[#allocation2 + $0x9]] }
  0x23   :  { %s177_s11 = smov [#allocation7]  }
  0x24   :  { %v43_v5 = vadd.s32 %v40_v3, %v39_v2  ;;  %v48_v7 = vstv %s47_s30  ;;  %v52_v8 = vstv %s103_s3  ;;  %s93_s12 = sshll.u32 %s177_s11, 4  ;;  %s94_s12 = int_to_ptr.vmem [resolvable:$true] %s93_s12 }
  0x25   :  { %v56_v9 = vstv %s104_s4  ;;  %v60_v11 = vstv %s105_s5  ;;  %s147_s13 = scalar_lea.vmem %s94_s12, 128  ;;  %p152_p12 = scmp.lt.s32.totalorder %s94_s12, %s94_s12 }
  0x26   :  { %v45_v6 = vsub.s32 %v43_v5, %v44_v4  ;;  %v64_v13 = vstv %s106_s6  ;;  %v68_v15 = vstv %s107_s7  ;;  %p148_p11 = scmp.ne.s32.totalorder %s94_s12, %s147_s13  ;;  %p153_p13 = scmp.lt.s32.totalorder %s147_s13, %s147_s13 }
  0x27   :  { %v72_v17 = vstv %s217_s8  ;;  %v76_v19 = vstv %s219_s1 }
  0x28   :  { %vm46_vm0 = vcmp.eq.s32.totalorder %v45_v6, 0  ;;  %vm50_vm1 = vcmp.eq.s32.totalorder %v45_v6, 1  ;;  %vm54_vm2 = vcmp.eq.s32.totalorder %v45_v6, 2  ;;  %vm58_vm3 = vcmp.eq.s32.totalorder %v45_v6, 3  ;;  %p154_p0 = por %p153_p13, %p152_p12 }
  0x29   :  { %v49_v10 = vsel %vm46_vm0, %v48_v7, 0.0  ;;  %vm62_vm4 = vcmp.eq.s32.totalorder %v45_v6, 4  ;;  %vm66_vm5 = vcmp.eq.s32.totalorder %v45_v6, 5  ;;  %vm70_vm6 = vcmp.eq.s32.totalorder %v45_v6, 6 }
  0x2a   :  { %v53_v12 = vsel %vm50_vm1, %v52_v8, %v49_v10  ;;  %vm74_vm7 = vcmp.eq.s32.totalorder %v45_v6, 7  ;;  %vm78_vm8 = vcmp.eq.s32.totalorder %v45_v6, 8  ;;  %v80_v21 = vstv %s221_s9  ;;  %p155_p1 = pnand %p154_p0, %p148_p11 }
  0x2b   :  { %v57_v14 = vsel %vm54_vm2, %v56_v9, %v53_v12  ;;  %vm82_vm9 = vcmp.eq.s32.totalorder %v45_v6, 9  ;;  %v84_v23 = vstv %s223_s10 }
  0x2c   :  { %v61_v16 = vsel %vm58_vm3, %v60_v11, %v57_v14 }
  0x2d   :  { %v65_v18 = vsel %vm62_vm4, %v64_v13, %v61_v16 }
  0x2e   :  { %v69_v20 = vsel %vm66_vm5, %v68_v15, %v65_v18 }
  0x2f   :  { %v73_v22 = vsel %vm70_vm6, %v72_v17, %v69_v20 }
  0x30   :  { %v77_v24 = vsel %vm74_vm7, %v76_v19, %v73_v22 }
  0x31   :  { %v81_v25 = vsel %vm78_vm8, %v80_v21, %v77_v24 }
  0x32   :  { %v85_v26 = vsel %vm82_vm9, %v84_v23, %v81_v25 }
  0x33   :  { %86 = vst [vmem:[#allocation7] sm:$0xff] %v85_v26 }
  0x34   :  { %158 = shalt.err (!%p155_p1)
}
  0x35   :  { %s159_s16 = scalar_lea.hbm %s243_s2, 128 }
  0x36   :  { %p160_p2 = scmp.ne.s32.totalorder %s243_s2, %s159_s16  ;;  %p163_p3 = scmp.lt.u32.totalorder %s159_s16, %s243_s2 }
  0x38   :  { %p165_p4 = pnand %p163_p3, %p160_p2 }
  0x3a   :  { %168 = shalt.err (!%p165_p4)
}
  0x3b   :  { %96 = dma.vmem_to_hbm [thread:$0]  %s94_s12, 128, %s243_s2, [#allocation4]  }
  0x3c   :  { %173 = dma.done.wait [#allocation4], 128  }
  0x3d   :  { %174 = vsyncadd [#allocation4], 4294967168 }
  0x3e   :  { %100 = vsyncpa [#allocation3], 1 }
  0x3f   :  { %101 = vsyncpa [#allocation4], 1 }
  0x40   :  { %102 = vsyncpa [#allocation5], 1 }

</bundles_post_ra>
